<compile_context>
chip_gen: v5e
topology: v5e:2x2
jax: 0.10.0
libtpu: 0.0.40
codegen_flags: <defaults>
</compile_context>

<pallas_src>
import numpy as np
import jax
import jax.numpy as jnp
from jax.experimental import pallas as pl
from jax.experimental.pallas import tpu as pltpu


def _round_up(x, m):
    return ((x + m - 1) // m) * m


def _choose_lane_tile(n, d):
    """Pick a large lane tile: amortize the ~0.35us per-grid-step overhead,
    keep >=2 tiles when possible (v7x megacore), stay inside a VMEM budget."""
    n128 = _round_up(n, 128)
    if n128 <= 256:
        tile = 128
    else:
        tile = min(32768, _round_up(max(n128 // 2, 128), 128))
    # VMEM budget (double-buffered x^T + priors^T + packed out), keep <= ~24MiB
    # so the tile is portable to v7x's 64 MiB physical / v5e defaults.
    max_tile = (24 * 1024 * 1024) // (2 * (d + 4 + 8) * 4)
    max_tile = max(128, (max_tile // 128) * 128)
    return min(tile, max_tile)


def _make_kernel(n_cls, var0, var1, thr):
    """Kernel over one lane tile.  xt_ref: (4+C, NT), pt_ref: (4, NT),
    out_ref: (8, NT) packed [xymin(2), xymax(2), conf, class_idx, keep, pad]."""

    def kernel(xt_ref, pt_ref, out_ref):
        x = xt_ref[...]
        loc = x[0:4, :]                      # (4, NT)
        cls = x[4:, :]                       # (C, NT)

        # Sublane reductions over the class axis (review: avoid serial chains).
        best = jnp.max(cls, axis=0, keepdims=True)        # (1, NT)
        e = jnp.exp(cls - best)                           # EUP, (C, NT)
        denom = jnp.sum(e, axis=0, keepdims=True)         # (1, NT)

        # argmax with first-max tie semantics: descending select chain, the
        # smallest matching class index is written last.  Class index carried
        # as f32 (exact for any realistic class count < 2^24).
        best_idx = jnp.zeros_like(best)
        for c in range(n_cls - 1, -1, -1):
            best_idx = jnp.where(cls[c:c + 1, :] >= best,
                                 jnp.float32(c), best_idx)

        # max(softmax) = 1 / sum(exp(cls - max)); EUP approx reciprocal.
        conf = pl.reciprocal(denom, approx=True)          # (1, NT)

        # SSD box decode on (2, NT) sublane slabs (variance baked in).
        pri = pt_ref[...]                                 # (4, NT)
        cxcy = pri[0:2, :] + loc[0:2, :] * var0 * pri[2:4, :]
        wh = pri[2:4, :] * jnp.exp(loc[2:4, :] * var1)
        xymin = cxcy - wh * 0.5

        # Exact keep decision: conf > thr  <=>  denom * thr < 1  (denom > 0),
        # so the approx reciprocal never flips a threshold decision.
        keep = jnp.logical_and(best_idx > 0.0, denom * thr < 1.0)

        # Direct row stores into the packed lane-dense output block.
        out_ref[0:2, :] = xymin
        out_ref[2:4, :] = xymin + wh
        out_ref[4:5, :] = conf
        out_ref[5:6, :] = best_idx
        out_ref[6:7, :] = keep.astype(jnp.float32)
        out_ref[7:8, :] = jnp.zeros_like(conf)            # deterministic pad row

    return kernel


def make_fpn_ssd_decoder(priors, variance, score_threshold, n_classes,
                         max_detections=None, lane_tile=None):
    """Returns forward(inp) -> (boxes, class_conf, class_pred, detections),
    matching FPNSSDDecoder.forward (with a static max_detections cap on the
    data-dependent filtering)."""
    priors = jnp.asarray(priors, dtype=jnp.float32)
    n = int(priors.shape[0])
    d = 4 + int(n_classes)
    var = np.asarray(jax.device_get(variance), dtype=np.float64)
    var0, var1 = float(var[0]), float(var[1])
    thr = float(np.asarray(jax.device_get(score_threshold)).reshape(-1)[0])

    if lane_tile is None:
        lane_tile = _choose_lane_tile(n, d)
    assert lane_tile % 128 == 0
    n_pad = _round_up(n, lane_tile)
    grid = (n_pad // lane_tile,)
    if max_detections is None:
        max_detections = n
    max_det = int(max_detections)

    # priors^T is constant across calls: transpose + pad ONCE at build time.
    p_t = jnp.pad(jnp.transpose(priors), ((0, 0), (0, n_pad - n)))

    kernel = _make_kernel(int(n_classes), var0, var1, thr)

    # Explicit VMEM budget (review: don't rely on the per-chip default).
    tile_io_bytes = 2 * (d + 4 + 8) * lane_tile * 4       # double-buffered I/O
    vmem_limit = int(min(max(6 * tile_io_bytes + (8 << 20), 16 << 20), 48 << 20))

    decode_call = pl.pallas_call(
        kernel,
        out_shape=jax.ShapeDtypeStruct((8, n_pad), jnp.float32),
        grid=grid,
        in_specs=[
            pl.BlockSpec((d, lane_tile), lambda i: (0, i)),   # x^T tile
            pl.BlockSpec((4, lane_tile), lambda i: (0, i)),   # priors^T tile
        ],
        out_specs=pl.BlockSpec((8, lane_tile), lambda i: (0, i)),
        compiler_params=pltpu.CompilerParams(
            # "parallel" shards anchor tiles across the 2 TCs on v7x
            # (no-op on v5e/v6e single-TC parts).
            dimension_semantics=("parallel",),
            vmem_limit_bytes=vmem_limit),
    )

    @jax.jit
    def run(inp):
        # Fused under one jit: transpose + pad + kernel + device compaction.
        x_t = jnp.transpose(inp[0]).astype(jnp.float32)        # (D, N)
        if n_pad != n:
            x_t = jnp.pad(x_t, ((0, 0), (0, n_pad - n)))       # zero logits ->
            # background argmax -> keep==0 for every padded anchor.
        packed = decode_call(x_t, p_t)                         # (8, n_pad)

        # Device-side compaction with a static cap: only (max_det, 6) + one
        # scalar ever cross the host boundary.
        keep = packed[6] > 0.5
        count = jnp.minimum(jnp.sum(keep.astype(jnp.int32)), max_det)
        (sel,) = jnp.nonzero(keep, size=max_det, fill_value=0)
        cols = packed[:, sel]                                  # (8, max_det)
        boxes = jnp.transpose(cols[0:4])                       # (max_det, 4)
        conf = cols[4]
        pred = cols[5] - 1.0                                   # background removed
        det = jnp.concatenate(
            [boxes, conf[:, None], pred[:, None]], axis=-1)    # (max_det, 6)
        return det, count

    def forward(inp):
        det_dev, count_dev = run(inp)
        count = int(count_dev)                                 # tiny scalar D2H
        det = np.asarray(det_dev)[:count]                      # (M, 6), M<=max_det
        boxes = det[:, 0:4]
        class_conf = det[:, 4]
        class_pred = det[:, 5].astype(np.int64)
        detections = det[None]                                 # (1, M, 6)
        return boxes, class_conf, class_pred, detections

    forward.run = run            # expose the jitted device-side function
    return forward


def _reference_numpy(inp, score_threshold, priors, variance):
    x = np.asarray(jax.device_get(inp), dtype=np.float64)[0]
    pri = np.asarray(jax.device_get(priors), dtype=np.float64)
    var = np.asarray(jax.device_get(variance), dtype=np.float64)
    loc, cls = x[:, :4], x[:, 4:]
    e = np.exp(cls - cls.max(-1, keepdims=True))
    p = e / e.sum(-1, keepdims=True)
    conf = p.max(-1)
    pred = p.argmax(-1)
    cxcy = pri[:, :2] + loc[:, :2] * var[0] * pri[:, 2:]
    wh = pri[:, 2:] * np.exp(loc[:, 2:] * var[1])
    xymin = cxcy - wh / 2.0
    boxes = np.concatenate([xymin, xymin + wh], axis=-1)
    thr = float(np.asarray(jax.device_get(score_threshold)).reshape(-1)[0])
    mask = (pred > 0) & (conf > thr)
    return boxes[mask], conf[mask], pred[mask] - 1


if __name__ == "__main__":
    key = jax.random.PRNGKey(0)
    N = 300            # deliberately NOT a multiple of 128 (exercises padding)
    n_classes = 4      # includes background class 0
    D = 4 + n_classes

    k1, k2, k3 = jax.random.split(key, 3)
    inp = jax.random.normal(k1, (1, N, D), dtype=jnp.float32)
    prior_centers = jax.random.uniform(k2, (N, 2), dtype=jnp.float32)
    prior_wh = 0.05 + 0.25 * jax.random.uniform(k3, (N, 2), dtype=jnp.float32)
    priors = jnp.concatenate([prior_centers, prior_wh], axis=-1)     # (N, 4)
    variance = jnp.array([0.1, 0.2], dtype=jnp.float32)              # (2,)
    score_threshold = jnp.array([0.3], dtype=jnp.float32)            # (1,)

    decoder = make_fpn_ssd_decoder(priors, variance, score_threshold,
                                   n_classes, max_detections=N)

    # Run the jitted kernel pipeline once and block on the device outputs.
    det_dev, count_dev = decoder.run(inp)
    jax.block_until_ready((det_dev, count_dev))
    assert det_dev.shape == (N, 6)

    boxes, conf, pred, detections = decoder(inp)
    ref_boxes, ref_conf, ref_pred = _reference_numpy(
        inp, score_threshold, priors, variance)

    assert boxes.shape == ref_boxes.shape, (boxes.shape, ref_boxes.shape)
    assert np.allclose(boxes, ref_boxes, atol=1e-4, rtol=1e-4)
    # conf uses the EUP approx reciprocal -> slightly looser tolerance.
    assert np.allclose(conf, ref_conf, atol=5e-3, rtol=5e-3)
    assert np.array_equal(pred, ref_pred)
    assert detections.shape == (1, boxes.shape[0], 6)

    print("KERNEL_OK")
</pallas_src>

<mosaic_0001>
module attributes {stable_mosaic.version = 11 : i64} {
  func.func @kernel(%arg0: i32, %arg1: memref<8x256xf32, #tpu.memory_space<vmem>>, %arg2: memref<4x256xf32, #tpu.memory_space<vmem>>, %arg3: memref<8x256xf32, #tpu.memory_space<vmem>>) attributes {dimension_semantics = [#tpu.dimension_semantics<parallel>], iteration_bounds = array<i64: 2>, scalar_prefetch = 0 : i64, scratch_operands = 0 : i64, tpu.core_type = #tpu.core_type<tc>, window_params = [{transform_indices = @transform_0, window_bounds = array<i64: 8, 256>}, {transform_indices = @transform_1, window_bounds = array<i64: 4, 256>}, {transform_indices = @transform_2, window_bounds = array<i64: 8, 256>}]} {
    %c0 = arith.constant 0 : index
    %c0_0 = arith.constant 0 : index
    %0 = vector.load %arg1[%c0, %c0_0] : memref<8x256xf32, #tpu.memory_space<vmem>>, vector<8x256xf32>
    %1 = vector.extract_strided_slice %0 {offsets = [0, 0], sizes = [4, 256], strides = [1, 1]} : vector<8x256xf32> to vector<4x256xf32>
    %2 = vector.extract_strided_slice %0 {offsets = [4, 0], sizes = [4, 256], strides = [1, 1]} : vector<8x256xf32> to vector<4x256xf32>
    %cst = arith.constant dense<0xFF800000> : vector<256xf32>
    %3 = vector.multi_reduction <maximumf>, %2, %cst [0] : vector<4x256xf32> to vector<256xf32>
    %4 = vector.shape_cast %3 : vector<256xf32> to vector<1x256xf32>
    %5 = vector.broadcast %4 : vector<1x256xf32> to vector<4x256xf32>
    %6 = arith.subf %2, %5 : vector<4x256xf32>
    %7 = math.exp %6 : vector<4x256xf32>
    %cst_1 = arith.constant dense<0.000000e+00> : vector<256xf32>
    %8 = vector.multi_reduction <add>, %7, %cst_1 [0] : vector<4x256xf32> to vector<256xf32>
    %9 = vector.shape_cast %8 : vector<256xf32> to vector<1x256xf32>
    %cst_2 = arith.constant 0.000000e+00 : f32
    %10 = vector.broadcast %cst_2 : f32 to vector<1x256xf32>
    %11 = vector.extract_strided_slice %2 {offsets = [3, 0], sizes = [1, 256], strides = [1, 1]} : vector<4x256xf32> to vector<1x256xf32>
    %12 = arith.cmpf oge, %11, %4 : vector<1x256xf32>
    %cst_3 = arith.constant 3.000000e+00 : f32
    %13 = vector.broadcast %cst_3 : f32 to vector<1x256xf32>
    %14 = arith.select %12, %13, %10 : vector<1x256xi1>, vector<1x256xf32>
    %15 = vector.extract_strided_slice %2 {offsets = [2, 0], sizes = [1, 256], strides = [1, 1]} : vector<4x256xf32> to vector<1x256xf32>
    %16 = arith.cmpf oge, %15, %4 : vector<1x256xf32>
    %cst_4 = arith.constant 2.000000e+00 : f32
    %17 = vector.broadcast %cst_4 : f32 to vector<1x256xf32>
    %18 = arith.select %16, %17, %14 : vector<1x256xi1>, vector<1x256xf32>
    %19 = vector.extract_strided_slice %2 {offsets = [1, 0], sizes = [1, 256], strides = [1, 1]} : vector<4x256xf32> to vector<1x256xf32>
    %20 = arith.cmpf oge, %19, %4 : vector<1x256xf32>
    %cst_5 = arith.constant 1.000000e+00 : f32
    %21 = vector.broadcast %cst_5 : f32 to vector<1x256xf32>
    %22 = arith.select %20, %21, %18 : vector<1x256xi1>, vector<1x256xf32>
    %23 = vector.extract_strided_slice %2 {offsets = [0, 0], sizes = [1, 256], strides = [1, 1]} : vector<4x256xf32> to vector<1x256xf32>
    %24 = arith.cmpf oge, %23, %4 : vector<1x256xf32>
    %cst_6 = arith.constant 0.000000e+00 : f32
    %25 = vector.broadcast %cst_6 : f32 to vector<1x256xf32>
    %26 = arith.select %24, %25, %22 : vector<1x256xi1>, vector<1x256xf32>
    %27 = tpu.reciprocal %9 {approx = true} : vector<1x256xf32> -> vector<1x256xf32>
    %c0_7 = arith.constant 0 : index
    %c0_8 = arith.constant 0 : index
    %28 = vector.load %arg2[%c0_7, %c0_8] : memref<4x256xf32, #tpu.memory_space<vmem>>, vector<4x256xf32>
    %29 = vector.extract_strided_slice %28 {offsets = [0, 0], sizes = [2, 256], strides = [1, 1]} : vector<4x256xf32> to vector<2x256xf32>
    %30 = vector.extract_strided_slice %1 {offsets = [0, 0], sizes = [2, 256], strides = [1, 1]} : vector<4x256xf32> to vector<2x256xf32>
    %cst_9 = arith.constant 1.000000e-01 : f32
    %31 = vector.broadcast %cst_9 : f32 to vector<2x256xf32>
    %32 = arith.mulf %30, %31 : vector<2x256xf32>
    %33 = vector.extract_strided_slice %28 {offsets = [2, 0], sizes = [2, 256], strides = [1, 1]} : vector<4x256xf32> to vector<2x256xf32>
    %34 = arith.mulf %32, %33 : vector<2x256xf32>
    %35 = arith.addf %29, %34 : vector<2x256xf32>
    %36 = vector.extract_strided_slice %28 {offsets = [2, 0], sizes = [2, 256], strides = [1, 1]} : vector<4x256xf32> to vector<2x256xf32>
    %37 = vector.extract_strided_slice %1 {offsets = [2, 0], sizes = [2, 256], strides = [1, 1]} : vector<4x256xf32> to vector<2x256xf32>
    %cst_10 = arith.constant 2.000000e-01 : f32
    %38 = vector.broadcast %cst_10 : f32 to vector<2x256xf32>
    %39 = arith.mulf %37, %38 : vector<2x256xf32>
    %40 = math.exp %39 : vector<2x256xf32>
    %41 = arith.mulf %36, %40 : vector<2x256xf32>
    %cst_11 = arith.constant 5.000000e-01 : f32
    %42 = vector.broadcast %cst_11 : f32 to vector<2x256xf32>
    %43 = arith.mulf %41, %42 : vector<2x256xf32>
    %44 = arith.subf %35, %43 : vector<2x256xf32>
    %cst_12 = arith.constant 0.000000e+00 : f32
    %45 = vector.broadcast %cst_12 : f32 to vector<1x256xf32>
    %46 = arith.cmpf ogt, %26, %45 : vector<1x256xf32>
    %cst_13 = arith.constant 3.000000e-01 : f32
    %47 = vector.broadcast %cst_13 : f32 to vector<1x256xf32>
    %48 = arith.mulf %9, %47 : vector<1x256xf32>
    %cst_14 = arith.constant 1.000000e+00 : f32
    %49 = vector.broadcast %cst_14 : f32 to vector<1x256xf32>
    %50 = arith.cmpf olt, %48, %49 : vector<1x256xf32>
    %51 = arith.andi %46, %50 : vector<1x256xi1>
    %c0_15 = arith.constant 0 : index
    %c0_16 = arith.constant 0 : index
    %52 = vector.load %arg3[%c0_15, %c0_16] : memref<8x256xf32, #tpu.memory_space<vmem>>, vector<2x256xf32>
    tpu.vector_store %arg3[%c0_15, %c0_16], %44 {strides = array<i32>} : memref<8x256xf32, #tpu.memory_space<vmem>>, vector<2x256xf32>,
    %53 = arith.addf %44, %41 : vector<2x256xf32>
    %c2 = arith.constant 2 : index
    %c0_17 = arith.constant 0 : index
    %54 = vector.load %arg3[%c2, %c0_17] : memref<8x256xf32, #tpu.memory_space<vmem>>, vector<2x256xf32>
    tpu.vector_store %arg3[%c2, %c0_17], %53 {strides = array<i32>} : memref<8x256xf32, #tpu.memory_space<vmem>>, vector<2x256xf32>,
    %c4 = arith.constant 4 : index
    %c0_18 = arith.constant 0 : index
    %55 = vector.load %arg3[%c4, %c0_18] : memref<8x256xf32, #tpu.memory_space<vmem>>, vector<1x256xf32>
    tpu.vector_store %arg3[%c4, %c0_18], %27 {strides = array<i32>} : memref<8x256xf32, #tpu.memory_space<vmem>>, vector<1x256xf32>,
    %c5 = arith.constant 5 : index
    %c0_19 = arith.constant 0 : index
    %56 = vector.load %arg3[%c5, %c0_19] : memref<8x256xf32, #tpu.memory_space<vmem>>, vector<1x256xf32>
    tpu.vector_store %arg3[%c5, %c0_19], %26 {strides = array<i32>} : memref<8x256xf32, #tpu.memory_space<vmem>>, vector<1x256xf32>,
    %57 = arith.extui %51 : vector<1x256xi1> to vector<1x256xi32>
    %58 = arith.sitofp %57 : vector<1x256xi32> to vector<1x256xf32>
    %c6 = arith.constant 6 : index
    %c0_20 = arith.constant 0 : index
    %59 = vector.load %arg3[%c6, %c0_20] : memref<8x256xf32, #tpu.memory_space<vmem>>, vector<1x256xf32>
    tpu.vector_store %arg3[%c6, %c0_20], %58 {strides = array<i32>} : memref<8x256xf32, #tpu.memory_space<vmem>>, vector<1x256xf32>,
    %cst_21 = arith.constant 0.000000e+00 : f32
    %60 = vector.broadcast %cst_21 : f32 to vector<1x256xf32>
    %c7 = arith.constant 7 : index
    %c0_22 = arith.constant 0 : index
    %61 = vector.load %arg3[%c7, %c0_22] : memref<8x256xf32, #tpu.memory_space<vmem>>, vector<1x256xf32>
    tpu.vector_store %arg3[%c7, %c0_22], %60 {strides = array<i32>} : memref<8x256xf32, #tpu.memory_space<vmem>>, vector<1x256xf32>,
    return
  }
  func.func @transform_0(%arg0: i32) -> (i32, i32) {
    %c0_i32 = arith.constant 0 : i32
    %c0_i32_0 = arith.constant 0 : i32
    return %c0_i32, %arg0 : i32, i32
  }
  func.func @transform_1(%arg0: i32) -> (i32, i32) {
    %c0_i32 = arith.constant 0 : i32
    %c0_i32_0 = arith.constant 0 : i32
    return %c0_i32, %arg0 : i32, i32
  }
  func.func @transform_2(%arg0: i32) -> (i32, i32) {
    %c0_i32 = arith.constant 0 : i32
    %c0_i32_0 = arith.constant 0 : i32
    return %c0_i32, %arg0 : i32, i32
  }
}

</mosaic_0001>

<bundles_post_ra>
// kernel: run.1
= control target key start
LH: loop header
LB: loop body
LE: loop exit
PB: predicated region body
PF: predicated region fallthrough
CT: control target
= control target key end

     0   :  { %s485_s9 = smov 0   ;;  %s590_s0 = inlined_call_operand.vmem [shape: f32[8,512], index: 0, kind: input, shape index: {}]   ;;  %s591_s1 = inlined_call_operand.vmem [shape: f32[4,512], index: 1, kind: input, shape index: {}]   ;;  %s592_s2 = inlined_call_operand.vmem [shape: f32[8,512], index: 2, kind: output, shape index: {}]  }
   0x1 LB: > { %s419_s10 = sadd.s32 4294967295, %s467_s9   ;;  %p423_p0 = scmp.ge.s32.totalorder %s467_s9, 1  ;;  %s467_s9 = sphi %s485_s9, %s12_s9  }
   0x2   : > { %p124_p1 = scmp.lt.s32.totalorder %s467_s9, 3 }
   0x4   : > { %p125_p2 = pnand %p423_p0, %p124_p1 }
   0x5   : > { %s424_s11 = sshll.u32 (!%p125_p2), %s419_s10, 1 }
   0x6   : > { %128 = sbr.rel (%p125_p2) target bundleno = 75 (0x4b), region = 28  ;;  %p152_p3 = scmp.lt.s32.totalorder (!%p125_p2), %s424_s11, 3 }
   0xb   : > { %s596_s11 = smov (!%p152_p3, %s424_s11), 3  ;;  %vm171_vm0 = vcmask 1047556   ;;  %vm198_vm1 = vcmask 1043456   ;;  %v317_v32 = vlaneseq  ;;  %v469_v39 = vmov 0.0  }
   0xc   : > { %s425_s12 = sshll.u32 %s596_s11, 3  ;;  %s427_s13 = sshll.u32 %s596_s11, 2  ;;  %vm314_vm11 = vcmask 1040384  }
   0xd   : > { %s155_s16 = scalar_lea.vmem %s590_s0, %s425_s12  ;;  %s161_s19 = scalar_lea.vmem %s591_s1, %s427_s13  ;;  %vm532_vm3 = vcmp.lt.s32.totalorder %v317_v32, 256 }
   0xe   : > { %v505_v0 = vld [vmem:[%s155_s16] sm:$0xff]  ;;  %v507_v1 = vld [vmem:[%s155_s16 + $0x8] sm:$0xff]  ;;  %s530_s22 = scalar_lea.vmem %s592_s2, %s425_s12 }
   0xf   : > { %v243_v2 = vld [vmem:[%s161_s19] sm:$0xff]  ;;  %v172_v3 = vsel %vm171_vm0, %v505_v0, -inf  ;;  %v179_v4 = vsel %vm171_vm0, %v507_v1, -inf  ;;  %v262_v7 = vmul.f32 0.2, %v505_v0 }
  0x10   : > { %247 = vst [vmem:[#allocation1] ss:$2 sm:$0xff] %v243_v2  ;;  %v173_v5 = vrot.slane %v172_v3, 4  ;;  %v180_v6 = vrot.slane %v179_v4, 4  ;;  %v263_v8 = vmul.f32 0.2, %v507_v1 }
  0x11   : > { %v264_v11 = vmul.f32 1.442695, %v262_v7  ;;  %v245_v15 = vmul.f32 0.1, %v507_v1  ;;  %v244_v20 = vmul.f32 0.1, %v505_v0 }
  0x12   : > { %v174_v9 = vmax.f32 %v172_v3, %v173_v5  ;;  %v181_v10 = vmax.f32 %v179_v4, %v180_v6  ;;  %v266_v12 = vmul.f32 1.442695, %v263_v8  ;;  %437 = vst.msk [vmem:[%s530_s22 + $0x7] ss:$8 sm:$0x3] %vm532_vm3, %v469_v39 }
  0x13   : > { %449 = vpow2.f32 %v264_v11 }
  0x14   : > { %v175_v13 = vrot.slane %v174_v9, 2  ;;  %v182_v14 = vrot.slane %v181_v10, 2  ;;  %451 = vpow2.f32 %v266_v12 }
  0x16   : > { %v176_v18 = vmax.f32 %v174_v9, %v175_v13  ;;  %v183_v19 = vmax.f32 %v181_v10, %v182_v14 }
  0x17   : > { %v248_v16 = vld.sshfl [vmem:[#allocation1] sm:$0xff pattern:$0x75316420]  ;;  %v249_v17 = vld.sshfl [vmem:[#allocation1 + $0x8] sm:$0xff pattern:$0x75316420] }
  0x18   : > { %v250_v21 = vrot.slane %v248_v16, 2  ;;  %v251_v22 = vrot.slane %v249_v17, 2  ;;  %v177_v23 = vrot.slane %v176_v18, 1  ;;  %v184_v24 = vrot.slane %v183_v19, 1 }
  0x19   : > { %v450_v26 = vpop.eup %449 }
  0x1a   : > { %v255_v25 = vmul.f32 %v251_v22, %v245_v15  ;;  %v515_v27 = vmax.f32 %v176_v18, %v177_v23  ;;  %v517_v28 = vmax.f32 %v183_v19, %v184_v24  ;;  %v452_v29 = vpop.eup %451  ;;  %v254_v30 = vmul.f32 %v250_v21, %v244_v20 }
  0x1b   : > { %v270_v33 = vrot.slane %v452_v29, 4 }
  0x1c   : > { %v258_v31 = vrot.slane %v255_v25, 4  ;;  %v186_v34 = vsub.f32 %v505_v0, %v515_v27  ;;  %vm213_vm2 = vcmp.ge.f32.partialorder %v505_v0, %v515_v27  ;;  %v187_v35 = vsub.f32 %v507_v1, %v517_v28 }
  0x1d   : > { %v271_v37 = vsel %vm198_vm1, %v450_v26, %v270_v33  ;;  %vm214_vm4 = vcmp.ge.f32.partialorder %v507_v1, %v517_v28  ;;  %v215_v41 = vsel %vm213_vm2, 3.0, %v469_v39 }
  0x1e   : > { %v188_v38 = vmul.f32 1.442695, %v186_v34  ;;  %v273_v40 = vmul.f32 %v271_v37, %v243_v2  ;;  %v190_v42 = vmul.f32 1.442695, %v187_v35  ;;  %v259_v43 = vsel %vm198_vm1, %v254_v30, %v258_v31 }
  0x1f   : > { %v216_v45 = vsel %vm214_vm4, 3.0, %v469_v39  ;;  %v219_v46 = vrot.slane %v215_v41, 1  ;;  %v261_v48 = vadd.f32 %v259_v43, %v243_v2 }
  0x20   : > { %453 = vpow2.f32 %v188_v38  ;;  %v274_v44 = vmul.f32 0.5, %v273_v40  ;;  %v220_v49 = vrot.slane %v216_v45, 1  ;;  %v431_v59 = vrot.slane %v273_v40, 10 }
  0x21   : > { %455 = vpow2.f32 %v190_v42  ;;  %v223_v52 = vsel %vm213_vm2, 2.0, %v219_v46 }
  0x22   : > { %v430_v47 = vrot.slane %v274_v44, 10  ;;  %v224_v56 = vsel %vm214_vm4, 2.0, %v220_v49  ;;  %v227_v57 = vrot.slane %v223_v52, 1 }
  0x23   : > { %v228_v63 = vrot.slane %v224_v56, 1 }
  0x24   : > { %v279_v50 = vsub.f32 %v261_v48, %v430_v47  ;;  %v231_v3 = vsel %vm213_vm2, 1.0, %v227_v57 }
  0x25   : > { %v232_v9 = vsel %vm214_vm4, 1.0, %v228_v63  ;;  %v235_v11 = vrot.slane %v231_v3, 1 }
  0x26   : > { %v454_v51 = vpop.eup %453  ;;  %289 = vst [vmem:[#allocation1] ss:$2 sm:$0xff] %v279_v50  ;;  %v300_v5 = vadd.f32 %v431_v59, %v279_v50  ;;  %v236_v14 = vrot.slane %v232_v9, 1 }
  0x27   : > { %v456_v53 = vpop.eup %455  ;;  %v194_v54 = vrot.slane %v454_v51, 4  ;;  %v239_v17 = vsel %vm213_vm2, 0.0, %v235_v11 }
  0x28   : > { %v195_v55 = vrot.slane %v456_v53, 4  ;;  %v240_v20 = vsel %vm214_vm4, 0.0, %v236_v14  ;;  %vm280_vm5 = vcmp.gt.f32.partialorder %v239_v17, 0.0 }
  0x29   : > { %v199_v58 = vsel %vm198_vm1, %v194_v54, 0.0  ;;  %vm281_vm6 = vcmp.gt.f32.partialorder %v240_v20, 0.0 }
  0x2a   : > { %v206_v60 = vsel %vm198_vm1, %v195_v55, 0.0  ;;  %v200_v61 = vrot.slane %v199_v58, 4 }
  0x2b   : > { %v207_v62 = vrot.slane %v206_v60, 4 }
  0x2c   : > { %v201_v2 = vadd.f32 %v200_v61, %v199_v58 }
  0x2d   : > { %v208_v4 = vadd.f32 %v207_v62, %v206_v60  ;;  %v290_v6 = vld.sshfl [vmem:[#allocation1] sm:$0xff pattern:$0x75316420]  ;;  %v291_v7 = vld.sshfl [vmem:[#allocation1 + $0x8] sm:$0xff pattern:$0x75316420] }
  0x2e   : > { %294 = vst [vmem:[%s530_s22] sm:$0x3] %v290_v6  ;;  %v202_v10 = vrot.slane %v201_v2, 2 }
  0x2f   : > { %v209_v8 = vrot.slane %v208_v4, 2  ;;  %302 = vst [vmem:[#allocation1] ss:$2 sm:$0xff] %v300_v5 }
  0x30   : > { %295 = vst [vmem:[%s530_s22 + $0x8] sm:$0x3] %v291_v7  ;;  %v203_v13 = vadd.f32 %v202_v10, %v201_v2 }
  0x31   : > { %v210_v12 = vadd.f32 %v209_v8, %v208_v4 }
  0x32   : > { %v204_v16 = vrot.slane %v203_v13, 1 }
  0x33   : > { %v211_v15 = vrot.slane %v210_v12, 1 }
  0x34   : > { %v205_v19 = vadd.f32 %v204_v16, %v203_v13 }
  0x35   : > { %v212_v18 = vadd.f32 %v211_v15, %v210_v12 }
  0x36   : > { %v303_v21 = vld.sshfl [vmem:[#allocation1] sm:$0xff pattern:$0x75316420]  ;;  %457 = vrcp.f32 %v205_v19  ;;  %v304_v23 = vld.sshfl [vmem:[#allocation1 + $0x8] sm:$0xff pattern:$0x75316420] }
  0x37   : > { %v283_v22 = vmul.f32 0.3, %v212_v18  ;;  %326 = vst [vmem:[#allocation1] sm:$0xff] %v239_v17  ;;  %v305_v24 = vrot.slane %v303_v21, 6  ;;  %459 = vrcp.f32 %v212_v18  ;;  %v306_v25 = vrot.slane %v304_v23, 6 }
  0x38   : > { %327 = vst [vmem:[#allocation1 + $0x9] sm:$0xff] %v240_v20  ;;  %v282_v0 = vmul.f32 0.3, %v205_v19 }
  0x39   : > { %vm285_vm7 = vcmp.lt.f32.partialorder %v283_v22, 1.0  ;;  %309 = vst [vmem:[%s530_s22] sm:$0xc] %v305_v24 }
  0x3a   : > { %310 = vst [vmem:[%s530_s22 + $0x8] sm:$0xc] %v306_v25  ;;  %vm284_vm8 = vcmp.lt.f32.partialorder %v282_v0, 1.0  ;;  %vm287_vm10 = vmand %vm281_vm6, %vm285_vm7 }
  0x3b   : > { %vm286_vm9 = vmand %vm280_vm5, %vm284_vm8  ;;  %v435_v30 = vsel %vm287_vm10, 1.0, %v469_v39 }
  0x3c   : > { %v458_v1 = vpop.eup %457  ;;  %v434_v27 = vsel %vm286_vm9, 1.0, %v469_v39 }
  0x3d   : > { %v460_v26 = vpop.eup %459 }
  0x3e   : > { %v313_v28 = vrot.slane %v460_v26, 7 }
  0x3f   : > { %v329_v29 = vld [vmem:[#allocation1 + $0x4] ss:$9 sm:$0xff] }
  0x40   : > { %433 = vst.msk [vmem:[%s530_s22 + $0x5] ss:$8 sm:$0x3] %vm532_vm3, %v329_v29  ;;  %v315_v31 = vsel %vm314_vm11, %v458_v1, %v313_v28 }
  0x41   : > { %340 = vst [vmem:[#allocation1] sm:$0xff] %v434_v27 }
  0x42   : > { %341 = vst [vmem:[#allocation1 + $0x9] sm:$0xff] %v435_v30 }
  0x43   : > { %432 = vst.msk [vmem:[%s530_s22 + $0x4] ss:$8 sm:$0x3] %vm532_vm3, %v315_v31 }
  0x49   : > { %v343_v32 = vld [vmem:[#allocation1 + $0x4] ss:$9 sm:$0xff] }
  0x4a   : > { %436 = vst.msk [vmem:[%s530_s22 + $0x6] ss:$8 sm:$0x3] %vm532_vm3, %v343_v32 }
  0x4b PF: > { %s12_s9 = sadd.s32 1, %s467_s9  }
  0x4c   : > { %p9_p4 = scmp.ge.s32.totalorder %s12_s9, 4  }
  0x4e   :  { %11 = sbr.rel (!%p9_p4) target bundleno = 1 (0x1), region = 67 }

// kernel: squeeze.7
= control target key start
LH: loop header
LB: loop body
LE: loop exit
PB: predicated region body
PF: predicated region fallthrough
CT: control target
= control target key end

     0   :  { %s46_s0 = inlined_call_operand.vmem [shape: f32[300], index: 0, kind: input, shape index: {}]   ;;  %s47_s1 = inlined_call_operand.vmem [shape: f32[300,1], index: 1, kind: output, shape index: {}]  }
   0x1   :  { %v4_v0 = vld [vmem:[%s46_s0] ss:$0 sm:$0xff]  ;;  %v14_v1 = vld [vmem:[%s46_s0 + $0x1] ss:$0 sm:$0xff]  ;;  %v16_v2 = vld [vmem:[%s46_s0 + $0x2] ss:$0 sm:$0xff] }
   0x2   :  { %5 = vst [vmem:[%s47_s1] sm:$0x1] %v4_v0 }
   0x3   :  { %15 = vst [vmem:[%s47_s1 + $0x1] sm:$0x1] %v14_v1 }
   0x4   :  { %17 = vst [vmem:[%s47_s1 + $0x2] sm:$0x1] %v16_v2 }

</bundles_post_ra>
